<compile_context>
chip_gen: v7x
topology: tpu7x:2x2x1
jax: 0.10.0
libtpu: 0.0.40
codegen_flags: <defaults>
</compile_context>

<pallas_src>
import jax
import jax.numpy as jnp
from jax.experimental import pallas as pl
from jax.experimental.pallas import tpu as pltpu


def _mul_kernel(a_ref, b_ref, o_ref):
    o_ref[...] = a_ref[...] * b_ref[...]


def _vmem_capacity_bytes():
    # Trace-time HW query; fall back to the smallest per-TC VMEM (v7x: 64 MiB).
    try:
        info = pltpu.get_tpu_info()
        cap = getattr(info, "vmem_capacity_bytes", None)
        if cap:
            return int(cap)
    except Exception:
        pass
    return 64 << 20


def _choose_lane_width(total, sublane):
    # Largest lane-dense width (multiple of 128) dividing the element count,
    # preferring widths that keep M = total // w at least one full sublane tile.
    candidates = [w for w in (4096, 2048, 1024, 512, 256, 128) if total % w == 0]
    if not candidates:
        return None
    for w in candidates:  # descending
        if total // w >= sublane:
            return w
    return candidates[-1]  # best effort: maximize M even if < sublane


def _round_up(x, m):
    return ((x + m - 1) // m) * m


def pallas_mul(a, b, *, force_pallas=False, min_pallas_bytes=512 * 1024):
    assert a.shape == b.shape and a.dtype == b.dtype
    orig_shape = a.shape
    total = a.size
    if total == 0:
        return jnp.zeros(orig_shape, a.dtype)

    itemsize = jnp.dtype(a.dtype).itemsize
    total_bytes = total * itemsize

    # Fast path: for tiny slabs the fixed pallas_call cost dominates; plain XLA wins.
    if total_bytes < min_pallas_bytes and not force_pallas:
        return a * b

    # Sublane multiple per dtype: 8 for f32, 16 for bf16, 32 for int8/fp8.
    sublane = max(8, 32 // itemsize)

    flat_a = a.reshape(-1)
    flat_b = b.reshape(-1)

    lane_w = _choose_lane_width(total, sublane)
    pad = 0
    if lane_w is None:
        # No 128-divisor: pad the tail to a multiple of (sublane * 128) and use a
        # lane-dense (M, 128) slab.  One small extra copy, but keeps vregs packed
        # and blocks well inside every generation's VMEM budget.
        lane_w = 128
        pad = (-total) % (sublane * lane_w)
        flat_a = jnp.pad(flat_a, (0, pad))
        flat_b = jnp.pad(flat_b, (0, pad))

    M = (total + pad) // lane_w
    a2 = flat_a.reshape(M, lane_w)
    b2 = flat_b.reshape(M, lane_w)

    # Generation-aware block sizing: 3 arrays x 2 pipeline buffers x block must fit
    # comfortably inside scoped VMEM (v7x: 64 MiB physical; v5e/v6e: 128 MiB).
    vmem_cap = _vmem_capacity_bytes()
    vmem_budget = int(vmem_cap * 3) // 4              # ~25% headroom
    max_block_bytes = min(8 << 20, max(1 << 20, vmem_budget // 8))

    tn = lane_w                                       # full-row blocks: contiguous DMA
    tm_cap = max(1, max_block_bytes // (tn * itemsize))
    if M <= tm_cap:
        if total_bytes > (1 << 20) and M >= 2 * sublane:
            # Guarantee >= 2 grid blocks so both v7x TensorCores get work.
            tm = _round_up(pl.cdiv(M, 2), sublane)
        else:
            tm = M                                    # block == full extent (always legal)
    else:
        tm = max(sublane, (tm_cap // sublane) * sublane)

    grid = (pl.cdiv(M, tm),)                          # 1-D grid: tn == lane_w always

    block_bytes = tm * tn * itemsize
    vmem_limit = int(min(vmem_budget, max(32 << 20, 6 * block_bytes + (8 << 20))))

    out = pl.pallas_call(
        _mul_kernel,
        out_shape=jax.ShapeDtypeStruct((M, lane_w), a.dtype),
        grid=grid,
        in_specs=[
            pl.BlockSpec((tm, tn), lambda i: (i, 0)),
            pl.BlockSpec((tm, tn), lambda i: (i, 0)),
        ],
        out_specs=pl.BlockSpec((tm, tn), lambda i: (i, 0)),
        compiler_params=pltpu.CompilerParams(
            dimension_semantics=("parallel",),
            vmem_limit_bytes=vmem_limit,
        ),
        cost_estimate=pl.CostEstimate(
            flops=total,
            transcendentals=0,
            bytes_accessed=3 * total * itemsize,
        ),
    )(a2, b2)

    out_flat = out.reshape(-1)
    if pad:
        out_flat = out_flat[:total]
    return out_flat.reshape(orig_shape)


if __name__ == "__main__":
    key = jax.random.PRNGKey(0)
    ka, kb = jax.random.split(key)

    # Small shape consistent with the module; force the Pallas kernel so it is
    # actually compiled and run on TPU.
    shape = (2, 4, 16, 16)
    a = jax.random.normal(ka, shape, dtype=jnp.float32)
    b = jax.random.normal(kb, shape, dtype=jnp.float32)

    out = pallas_mul(a, b, force_pallas=True)
    jax.block_until_ready(out)
    ref = a * b
    assert out.shape == ref.shape and out.dtype == ref.dtype
    assert jnp.allclose(out, ref, atol=1e-6, rtol=1e-6)

    # Default dispatch (tiny input -> XLA fast path), still correct.
    out_fast = pallas_mul(a, b)
    jax.block_until_ready(out_fast)
    assert jnp.allclose(out_fast, ref, atol=1e-6, rtol=1e-6)

    # Medium slab: natural Pallas path with a >=2-block grid (exercises both
    # v7x TensorCores and the pipelined multi-step loop).
    shape2 = (4, 8, 128, 128)
    a2 = jax.random.normal(ka, shape2, dtype=jnp.float32)
    b2 = jax.random.normal(kb, shape2, dtype=jnp.float32)
    out2 = pallas_mul(a2, b2)
    jax.block_until_ready(out2)
    assert jnp.allclose(out2, a2 * b2, atol=1e-6, rtol=1e-6)

    print("KERNEL_OK")
</pallas_src>

<mosaic_0001>
module attributes {stable_mosaic.version = 11 : i64} {
  func.func @_mul_kernel(%arg0: i32, %arg1: memref<8x256xf32, #tpu.memory_space<vmem>>, %arg2: memref<8x256xf32, #tpu.memory_space<vmem>>, %arg3: memref<8x256xf32, #tpu.memory_space<vmem>>) attributes {dimension_semantics = [#tpu.dimension_semantics<parallel>], iteration_bounds = array<i64: 1>, scalar_prefetch = 0 : i64, scratch_operands = 0 : i64, tpu.core_type = #tpu.core_type<tc>, window_params = [{transform_indices = @transform_0, window_bounds = array<i64: 8, 256>}, {transform_indices = @transform_1, window_bounds = array<i64: 8, 256>}, {transform_indices = @transform_2, window_bounds = array<i64: 8, 256>}]} {
    %c0 = arith.constant 0 : index
    %c0_0 = arith.constant 0 : index
    %0 = vector.load %arg1[%c0, %c0_0] : memref<8x256xf32, #tpu.memory_space<vmem>>, vector<8x256xf32>
    %c0_1 = arith.constant 0 : index
    %c0_2 = arith.constant 0 : index
    %1 = vector.load %arg2[%c0_1, %c0_2] : memref<8x256xf32, #tpu.memory_space<vmem>>, vector<8x256xf32>
    %2 = arith.mulf %0, %1 : vector<8x256xf32>
    %c0_3 = arith.constant 0 : index
    %c0_4 = arith.constant 0 : index
    %3 = vector.load %arg3[%c0_3, %c0_4] : memref<8x256xf32, #tpu.memory_space<vmem>>, vector<8x256xf32>
    tpu.vector_store %arg3[%c0_3, %c0_4], %2 {strides = array<i32>} : memref<8x256xf32, #tpu.memory_space<vmem>>, vector<8x256xf32>,
    return
  }
  func.func @transform_0(%arg0: i32) -> (i32, i32) {
    %c0_i32 = arith.constant 0 : i32
    %c0_i32_0 = arith.constant 0 : i32
    return %arg0, %c0_i32 : i32, i32
  }
  func.func @transform_1(%arg0: i32) -> (i32, i32) {
    %c0_i32 = arith.constant 0 : i32
    %c0_i32_0 = arith.constant 0 : i32
    return %arg0, %c0_i32 : i32, i32
  }
  func.func @transform_2(%arg0: i32) -> (i32, i32) {
    %c0_i32 = arith.constant 0 : i32
    %c0_i32_0 = arith.constant 0 : i32
    return %arg0, %c0_i32 : i32, i32
  }
}

</mosaic_0001>

<bundles_post_ra>
// kernel: tpu_custom_call.1
= control target key start
LH: loop header
LB: loop body
LE: loop exit
PB: predicated region body
PF: predicated region fallthrough
CT: control target
= control target key end

     0   :  { %7 = vsyncpa [#allocation3], 0  ;;  %s189_s0 = inlined_call_operand.hbm [shape: f32[8,256], index: 0, kind: input, shape index: {}]   ;;  %s190_s1 = inlined_call_operand.hbm [shape: f32[8,256], index: 1, kind: input, shape index: {}]   ;;  %s191_s2 = inlined_call_operand.hbm [shape: f32[8,256], index: 2, kind: output, shape index: {}]  }
   0x1   :  { %8 = vsyncpa [#allocation6], 0 }
   0x2   :  { %9 = vsyncpa [#allocation4], 0  ;;  %s135_s9 = smov [#allocation2]   ;;  %s136_s11 = smov [#allocation5]  }
   0x3   :  { %s16_s10 = sshll.u32 %s135_s9, 4  ;;  %s26_s12 = sshll.u32 %s136_s11, 4  ;;  %s17_s10 = int_to_ptr.vmem [resolvable:$true] %s16_s10  ;;  %s27_s12 = int_to_ptr.vmem [resolvable:$true] %s26_s12 }
   0x4   :  { %s63_s15 = scalar_lea.hbm %s189_s0, 256 }
   0x5   :  { %p64_p0 = scmp.ne.s32.totalorder %s189_s0, %s63_s15  ;;  %p67_p1 = scmp.lt.u32.totalorder %s63_s15, %s189_s0 }
   0x7   :  { %p69_p2 = pnand %p67_p1, %p64_p0 }
   0x9   :  { %72 = shalt.err (!%p69_p2)
}
   0xa   :  { %s73_s20 = scalar_lea.vmem %s17_s10, 256  ;;  %p78_p4 = scmp.lt.s32.totalorder %s17_s10, %s17_s10 }
   0xb   :  { %p74_p3 = scmp.ne.s32.totalorder %s17_s10, %s73_s20  ;;  %p79_p5 = scmp.lt.s32.totalorder %s73_s20, %s73_s20 }
   0xd   :  { %p80_p6 = por %p79_p5, %p78_p4 }
   0xf   :  { %p81_p7 = pnand %p80_p6, %p74_p3 }
  0x11   :  { %84 = shalt.err (!%p81_p7)
}
  0x12   :  { %19 = dma.hbm_to_vmem [thread:$0]  %s189_s0, 256, %s17_s10, [#allocation3]  }
  0x13   :  { %s85_s25 = scalar_lea.hbm %s190_s1, 256 }
  0x14   :  { %p86_p8 = scmp.ne.s32.totalorder %s190_s1, %s85_s25  ;;  %p89_p9 = scmp.lt.u32.totalorder %s85_s25, %s190_s1 }
  0x16   :  { %p91_p10 = pnand %p89_p9, %p86_p8 }
  0x18   :  { %94 = shalt.err (!%p91_p10)
}
  0x19   :  { %s95_s30 = scalar_lea.vmem %s27_s12, 256  ;;  %p100_p12 = scmp.lt.s32.totalorder %s27_s12, %s27_s12 }
  0x1a   :  { %p96_p11 = scmp.ne.s32.totalorder %s27_s12, %s95_s30  ;;  %p101_p13 = scmp.lt.s32.totalorder %s95_s30, %s95_s30 }
  0x1c   :  { %p102_p0 = por %p101_p13, %p100_p12 }
  0x1e   :  { %p103_p1 = pnand %p102_p0, %p96_p11 }
  0x20   :  { %106 = shalt.err (!%p103_p1)
}
  0x21   :  { %29 = dma.hbm_to_vmem [thread:$0]  %s190_s1, 256, %s27_s12, [#allocation6]  }
  0x22   :  { %129 = dma.done.wait [#allocation3], 256  }
  0x23   :  { %130 = vsyncadd [#allocation3], 4294967040 }
  0x24   :  { %131 = dma.done.wait [#allocation6], 256  }
  0x25   :  { %132 = vsyncadd [#allocation6], 4294967040  ;;  %s137_s4 = smov [#allocation7]   ;;  %v36_v0 = vld [vmem:[#allocation2] sm:$0xff]  ;;  %v38_v1 = vld [vmem:[#allocation5] sm:$0xff] }
  0x26   :  { %s50_s5 = sshll.u32 %s137_s4, 4  ;;  %v37_v2 = vld [vmem:[#allocation2 + $0x8] sm:$0xff]  ;;  %v40_v3 = vmul.f32 %v38_v1, %v36_v0  ;;  %v39_v4 = vld [vmem:[#allocation5 + $0x8] sm:$0xff]  ;;  %s51_s5 = int_to_ptr.vmem [resolvable:$true] %s50_s5 }
  0x27   :  { %v41_v5 = vmul.f32 %v39_v4, %v37_v2  ;;  %s107_s6 = scalar_lea.vmem %s51_s5, 256  ;;  %p112_p3 = scmp.lt.s32.totalorder %s51_s5, %s51_s5 }
  0x28   :  { %42 = vst [vmem:[#allocation7] sm:$0xff] %v40_v3  ;;  %p108_p2 = scmp.ne.s32.totalorder %s51_s5, %s107_s6  ;;  %p113_p4 = scmp.lt.s32.totalorder %s107_s6, %s107_s6 }
  0x29   :  { %43 = vst [vmem:[#allocation7 + $0x8] sm:$0xff] %v41_v5 }
  0x2a   :  { %p114_p5 = por %p113_p4, %p112_p3 }
  0x2c   :  { %p115_p6 = pnand %p114_p5, %p108_p2 }
  0x2e   :  { %118 = shalt.err (!%p115_p6)
}
  0x2f   :  { %s119_s8 = scalar_lea.hbm %s191_s2, 256 }
  0x30   :  { %p120_p7 = scmp.ne.s32.totalorder %s191_s2, %s119_s8  ;;  %p123_p8 = scmp.lt.u32.totalorder %s119_s8, %s191_s2 }
  0x32   :  { %p125_p9 = pnand %p123_p8, %p120_p7 }
  0x34   :  { %128 = shalt.err (!%p125_p9)
}
  0x35   :  { %53 = dma.vmem_to_hbm [thread:$0]  %s51_s5, 256, %s191_s2, [#allocation4]  }
  0x36   :  { %133 = dma.done.wait [#allocation4], 256  }
  0x37   :  { %134 = vsyncadd [#allocation4], 4294967040 }
  0x38   :  { %57 = vsyncpa [#allocation3], 1 }
  0x39   :  { %58 = vsyncpa [#allocation6], 1 }
  0x3a   :  { %59 = vsyncpa [#allocation4], 1 }

</bundles_post_ra>
